<compile_context>
chip_gen: v7x
topology: tpu7x:2x2x1
jax: 0.10.0
libtpu: 0.0.40
codegen_flags: <defaults>
</compile_context>

<pallas_src>
import functools

import jax
import jax.numpy as jnp
from jax import lax
from jax.experimental import pallas as pl
from jax.experimental.pallas import tpu as pltpu

LANE = 128


def _round_up(x, m):
    return (x + m - 1) // m * m


# ----------------------------------------------------------------------------
# Fused per-batch kernel: encoder -> embedding gather -> attention -> logits
# ----------------------------------------------------------------------------
def _fused_kernel(x_ref, w_enc_ref, b_enc_ref, tgt_ref, emb_ref,
                  w_out_q_ref, w_out_c_ref, b_out_ref, out_ref, *,
                  hidden_dim, vocab_pad):
    f32 = jnp.float32
    bf16 = jnp.bfloat16

    # ---- encoder: tanh(x @ W_enc + b_enc) -----------------------------------
    # bf16 operands for the MXU, f32 accumulation; tanh stays f32 (v5e-safe).
    x = x_ref[0].astype(bf16)                                  # (T_enc, D_in)
    enc_f32 = jnp.tanh(
        jnp.dot(x, w_enc_ref[...], preferred_element_type=f32)
        + b_enc_ref[...])                                      # (T_enc, Hp) f32
    enc = enc_f32.astype(bf16)                                 # MXU operand

    # ---- target embedding lookup as one-hot matmul (MXU, no gather) ---------
    # targets are guaranteed < V by the caller; an OOB id would silently give a
    # zero embedding row (same behavior as padding).
    tgt = tgt_ref[0]                                           # (T_dec, 1) int32
    t_dec = tgt.shape[0]
    iota_v = lax.broadcasted_iota(jnp.int32, (t_dec, vocab_pad), 1)
    onehot = (tgt == iota_v).astype(bf16)                      # (T_dec, Vp)
    q_f32 = jnp.dot(onehot, emb_ref[...],
                    preferred_element_type=f32)                # (T_dec, Hp)
    q = q_f32.astype(bf16)

    # ---- scaled dot-product cross attention (K == V == enc) -----------------
    # Contraction on axis 1 of both operands (q @ enc^T): accept the MXU's
    # transposed-operand path here so enc keeps its (T_enc, H) layout for the
    # context matmul below (no XLU relayout of enc).
    scale = 1.0 / jnp.sqrt(f32(hidden_dim))
    scores = lax.dot_general(
        q, enc, (((1,), (1,)), ((), ())),
        preferred_element_type=f32) * scale                    # (T_dec, T_enc)

    # Softmax in f32 (v5e has no bf16 EUP); reciprocal on the EUP slot.
    m = jnp.max(scores, axis=-1, keepdims=True)
    p = jnp.exp(scores - m)
    denom = jnp.sum(p, axis=-1, keepdims=True)
    attn = (p * pl.reciprocal(denom, approx=True)).astype(bf16)
    context = jnp.dot(attn, enc,
                      preferred_element_type=f32)              # (T_dec, Hp) f32

    # ---- output projection: split weights instead of concat -----------------
    logits = (jnp.dot(q, w_out_q_ref[...], preferred_element_type=f32)
              + jnp.dot(context.astype(bf16), w_out_c_ref[...],
                        preferred_element_type=f32)
              + b_out_ref[...])                                # (T_dec, Vp) f32
    out_ref[0] = logits


# ----------------------------------------------------------------------------
# One-time parameter preparation: pad to lane-aligned shapes, cast MXU
# operands to bf16.  Done ONCE, not per forward call.
# ----------------------------------------------------------------------------
def prepare_kernel_params(params):
    D_in, H = params["w_enc"].shape
    V = params["w_out"].shape[1]
    Hp = _round_up(H, LANE)
    Vp = _round_up(V, LANE)
    # Zero-padding of H / V is a mathematical no-op: padded hidden columns are
    # tanh(0)=0 and hit zero weight rows; padded vocab rows/cols never match a
    # real target id and only produce extra (discarded / unread) logit lanes.
    return {
        "hidden_dim": H,
        "vocab_size": V,
        # D_in axis deliberately left unpadded (matches unpadded input block).
        "w_enc": jnp.pad(params["w_enc"], ((0, 0), (0, Hp - H))
                         ).astype(jnp.bfloat16),
        "b_enc": jnp.pad(params["b_enc"], ((0, 0), (0, Hp - H))
                         ).astype(jnp.float32),
        "emb": jnp.pad(params["embedding"], ((0, Vp - V), (0, Hp - H))
                       ).astype(jnp.bfloat16),
        "w_out_q": jnp.pad(params["w_out"][:H], ((0, Hp - H), (0, Vp - V))
                           ).astype(jnp.bfloat16),
        "w_out_c": jnp.pad(params["w_out"][H:], ((0, Hp - H), (0, Vp - V))
                           ).astype(jnp.bfloat16),
        "b_out": jnp.pad(params["b_out"], ((0, 0), (0, Vp - V))
                         ).astype(jnp.float32),
    }


# ----------------------------------------------------------------------------
# SpellingCorrector.forward  ==  decoder(targets, encoder(inputs))
# ----------------------------------------------------------------------------
def spelling_corrector_forward(kparams, inputs, targets):
    B, T_enc, D_in = inputs.shape
    _, T_dec = targets.shape
    H = kparams["hidden_dim"]
    V = kparams["vocab_size"]
    Hp = kparams["w_enc"].shape[1]
    Vp = kparams["emb"].shape[0]

    # TODO(synk): for realistic sizes, scalar-prefetch targets (SMEM) and
    # row-gather the embedding instead of the (T_dec, 1) VMEM block + one-hot.
    tgt3 = targets.astype(jnp.int32)[:, :, None]               # (B, T_dec, 1)

    kernel = functools.partial(_fused_kernel, hidden_dim=H, vocab_pad=Vp)

    # Weights have a constant index_map across the grid -> single-buffer them
    # (no wasted second VMEM copy).
    def wspec(shape):
        return pl.BlockSpec(shape, lambda b: (0, 0),
                            pipeline_mode=pl.Buffered(1))

    logits_p = pl.pallas_call(
        kernel,
        out_shape=jax.ShapeDtypeStruct((B, T_dec, Vp), jnp.float32),
        grid=(B,),
        in_specs=[
            # inputs: unpadded feature dim (== full array dim, legal) -> no
            # HBM-side pad copy and 4x less per-step input DMA at D_in=32.
            pl.BlockSpec((1, T_enc, D_in), lambda b: (b, 0, 0)),
            wspec((D_in, Hp)),                                  # W_enc  (bf16)
            wspec((1, Hp)),                                     # b_enc  (f32)
            pl.BlockSpec((1, T_dec, 1), lambda b: (b, 0, 0)),   # targets
            wspec((Vp, Hp)),                                    # embedding
            wspec((Hp, Vp)),                                    # W_out[:H]
            wspec((Hp, Vp)),                                    # W_out[H:]
            wspec((1, Vp)),                                     # b_out
        ],
        out_specs=pl.BlockSpec((1, T_dec, Vp), lambda b: (b, 0, 0)),
        compiler_params=pltpu.CompilerParams(
            # B>=2 gives both v7x TensorCores work; neutral on v5e/v6e.
            dimension_semantics=("parallel",),
            vmem_limit_bytes=32 * 1024 * 1024),
    )(inputs, kparams["w_enc"], kparams["b_enc"], tgt3, kparams["emb"],
      kparams["w_out_q"], kparams["w_out_c"], kparams["b_out"])

    if Vp == V:
        return logits_p                 # avoid an extra full HBM copy
    return logits_p[:, :, :V]           # only when V is not lane-aligned


# ----------------------------------------------------------------------------
# Pure-JAX reference (original module semantics: concat + single W_out), f32.
# ----------------------------------------------------------------------------
def reference_forward(params, inputs, targets):
    H = params["w_enc"].shape[1]
    enc = jnp.tanh(inputs @ params["w_enc"] + params["b_enc"])
    q = jnp.take(params["embedding"], targets, axis=0)
    scale = 1.0 / jnp.sqrt(jnp.float32(H))
    scores = jnp.einsum("btd,bsd->bts", q, enc) * scale
    attn = jax.nn.softmax(scores, axis=-1)
    ctx = jnp.einsum("bts,bsd->btd", attn, enc)
    feat = jnp.concatenate([q, ctx], axis=-1)
    return feat @ params["w_out"] + params["b_out"]


def init_params(key, d_in, hidden, vocab):
    k1, k2, k3, _ = jax.random.split(key, 4)
    return {
        "w_enc": jax.random.normal(k1, (d_in, hidden), jnp.float32) * 0.1,
        "b_enc": jnp.zeros((1, hidden), jnp.float32),
        "embedding": jax.random.normal(k2, (vocab, hidden), jnp.float32) * 0.1,
        "w_out": jax.random.normal(k3, (2 * hidden, vocab), jnp.float32) * 0.1,
        "b_out": jnp.zeros((1, vocab), jnp.float32),
    }


if __name__ == "__main__":
    B, T_ENC, D_IN, H, T_DEC, VOCAB = 2, 16, 32, 32, 8, 128

    key = jax.random.PRNGKey(0)
    k_in, k_tgt, k_par = jax.random.split(key, 3)

    inputs = jax.random.normal(k_in, (B, T_ENC, D_IN), jnp.float32)
    targets = jax.random.randint(k_tgt, (B, T_DEC), 0, VOCAB, jnp.int32)
    params = init_params(k_par, D_IN, H, VOCAB)
    kparams = prepare_kernel_params(params)          # one-time pad + bf16 cast

    logits = spelling_corrector_forward(kparams, inputs, targets)
    jax.block_until_ready(logits)

    assert logits.shape == (B, T_DEC, VOCAB)
    assert logits.dtype == jnp.float32

    ref = reference_forward(params, inputs, targets)
    # bf16 MXU operands + approx reciprocal -> compare at 2e-2 tolerance.
    assert jnp.allclose(logits, ref, rtol=2e-2, atol=2e-2), (
        float(jnp.max(jnp.abs(logits - ref))))

    print("KERNEL_OK")
</pallas_src>

<mosaic_0001>
module attributes {stable_mosaic.version = 11 : i64} {
  func.func @_fused_kernel(%arg0: i32, %arg1: memref<1x16x32xf32, #tpu.memory_space<vmem>>, %arg2: memref<32x128xbf16, #tpu.memory_space<vmem>>, %arg3: memref<1x128xf32, #tpu.memory_space<vmem>>, %arg4: memref<1x8x1xi32, #tpu.memory_space<vmem>>, %arg5: memref<128x128xbf16, #tpu.memory_space<vmem>>, %arg6: memref<128x128xbf16, #tpu.memory_space<vmem>>, %arg7: memref<128x128xbf16, #tpu.memory_space<vmem>>, %arg8: memref<1x128xf32, #tpu.memory_space<vmem>>, %arg9: memref<1x8x128xf32, #tpu.memory_space<vmem>>) attributes {dimension_semantics = [#tpu.dimension_semantics<parallel>], iteration_bounds = array<i64: 2>, scalar_prefetch = 0 : i64, scratch_operands = 0 : i64, tpu.core_type = #tpu.core_type<tc>, window_params = [{transform_indices = @transform_0, window_bounds = array<i64: 1, 16, 32>}, {pipeline_mode = #tpu.pipeline_mode<synchronous>, transform_indices = @transform_1, window_bounds = array<i64: 32, 128>}, {pipeline_mode = #tpu.pipeline_mode<synchronous>, transform_indices = @transform_2, window_bounds = array<i64: 1, 128>}, {transform_indices = @transform_3, window_bounds = array<i64: 1, 8, 1>}, {pipeline_mode = #tpu.pipeline_mode<synchronous>, transform_indices = @transform_4, window_bounds = array<i64: 128, 128>}, {pipeline_mode = #tpu.pipeline_mode<synchronous>, transform_indices = @transform_5, window_bounds = array<i64: 128, 128>}, {pipeline_mode = #tpu.pipeline_mode<synchronous>, transform_indices = @transform_6, window_bounds = array<i64: 128, 128>}, {pipeline_mode = #tpu.pipeline_mode<synchronous>, transform_indices = @transform_7, window_bounds = array<i64: 1, 128>}, {transform_indices = @transform_8, window_bounds = array<i64: 1, 8, 128>}]} {
    %c0 = arith.constant 0 : index
    %c0_0 = arith.constant 0 : index
    %c0_1 = arith.constant 0 : index
    %0 = vector.load %arg1[%c0, %c0_0, %c0_1] : memref<1x16x32xf32, #tpu.memory_space<vmem>>, vector<1x16x32xf32>
    %1 = vector.shape_cast %0 : vector<1x16x32xf32> to vector<16x32xf32>
    %2 = arith.truncf %1 : vector<16x32xf32> to vector<16x32xbf16>
    %c0_2 = arith.constant 0 : index
    %c0_3 = arith.constant 0 : index
    %3 = vector.load %arg2[%c0_2, %c0_3] : memref<32x128xbf16, #tpu.memory_space<vmem>>, vector<32x128xbf16>
    %cst = arith.constant dense<0.000000e+00> : vector<16x128xf32>
    %4 = tpu.matmul %2, %3, %cst {dimension_numbers = #tpu.dot_dimension_numbers<[1], [0], [0], [1], [0, 0, 1, 1], [], []>} : vector<16x32xbf16>, vector<32x128xbf16>, vector<16x128xf32> -> vector<16x128xf32>
    %c0_4 = arith.constant 0 : index
    %c0_5 = arith.constant 0 : index
    %5 = vector.load %arg3[%c0_4, %c0_5] : memref<1x128xf32, #tpu.memory_space<vmem>>, vector<1x128xf32>
    %6 = vector.broadcast %5 : vector<1x128xf32> to vector<16x128xf32>
    %7 = arith.addf %4, %6 : vector<16x128xf32>
    %8 = math.tanh %7 : vector<16x128xf32>
    %9 = arith.truncf %8 : vector<16x128xf32> to vector<16x128xbf16>
    %c0_6 = arith.constant 0 : index
    %c0_7 = arith.constant 0 : index
    %c0_8 = arith.constant 0 : index
    %10 = vector.load %arg4[%c0_6, %c0_7, %c0_8] : memref<1x8x1xi32, #tpu.memory_space<vmem>>, vector<1x8x1xi32>
    %11 = vector.shape_cast %10 : vector<1x8x1xi32> to vector<8x1xi32>
    %12 = tpu.iota {dimensions = array<i32: 1>} : vector<8x128xi32>
    %13 = vector.broadcast %11 : vector<8x1xi32> to vector<8x128xi32>
    %14 = arith.cmpi eq, %13, %12 : vector<8x128xi32>
    %15 = arith.extui %14 : vector<8x128xi1> to vector<8x128xi32>
    %16 = arith.sitofp %15 : vector<8x128xi32> to vector<8x128xf32>
    %17 = arith.truncf %16 : vector<8x128xf32> to vector<8x128xbf16>
    %c0_9 = arith.constant 0 : index
    %c0_10 = arith.constant 0 : index
    %18 = vector.load %arg5[%c0_9, %c0_10] : memref<128x128xbf16, #tpu.memory_space<vmem>>, vector<128x128xbf16>
    %cst_11 = arith.constant dense<0.000000e+00> : vector<8x128xf32>
    %19 = tpu.matmul %17, %18, %cst_11 {dimension_numbers = #tpu.dot_dimension_numbers<[1], [0], [0], [1], [0, 0, 1, 1], [], []>} : vector<8x128xbf16>, vector<128x128xbf16>, vector<8x128xf32> -> vector<8x128xf32>
    %20 = arith.truncf %19 : vector<8x128xf32> to vector<8x128xbf16>
    %cst_12 = arith.constant 3.200000e+01 : f32
    %21 = math.sqrt %cst_12 : f32
    %cst_13 = arith.constant 1.000000e+00 : f32
    %22 = arith.divf %cst_13, %21 : f32
    %cst_14 = arith.constant dense<0.000000e+00> : vector<8x16xf32>
    %23 = tpu.matmul %20, %9, %cst_14 {dimension_numbers = #tpu.dot_dimension_numbers<[1], [1], [0], [0], [0, 0, 1, 0], [], []>} : vector<8x128xbf16>, vector<16x128xbf16>, vector<8x16xf32> -> vector<8x16xf32>
    %24 = vector.broadcast %22 : f32 to vector<8x16xf32>
    %25 = arith.mulf %23, %24 : vector<8x16xf32>
    %cst_15 = arith.constant dense<0xFF800000> : vector<8xf32>
    %26 = vector.multi_reduction <maximumf>, %25, %cst_15 [1] : vector<8x16xf32> to vector<8xf32>
    %27 = vector.shape_cast %26 : vector<8xf32> to vector<8x1xf32>
    %28 = vector.broadcast %27 : vector<8x1xf32> to vector<8x16xf32>
    %29 = arith.subf %25, %28 : vector<8x16xf32>
    %30 = math.exp %29 : vector<8x16xf32>
    %cst_16 = arith.constant dense<0.000000e+00> : vector<8xf32>
    %31 = vector.multi_reduction <add>, %30, %cst_16 [1] : vector<8x16xf32> to vector<8xf32>
    %32 = vector.shape_cast %31 : vector<8xf32> to vector<8x1xf32>
    %33 = tpu.reciprocal %32 {approx = true} : vector<8x1xf32> -> vector<8x1xf32>
    %34 = vector.broadcast %33 : vector<8x1xf32> to vector<8x16xf32>
    %35 = arith.mulf %30, %34 : vector<8x16xf32>
    %36 = arith.truncf %35 : vector<8x16xf32> to vector<8x16xbf16>
    %cst_17 = arith.constant dense<0.000000e+00> : vector<8x128xf32>
    %37 = tpu.matmul %36, %9, %cst_17 {dimension_numbers = #tpu.dot_dimension_numbers<[1], [0], [0], [1], [0, 0, 1, 1], [], []>} : vector<8x16xbf16>, vector<16x128xbf16>, vector<8x128xf32> -> vector<8x128xf32>
    %c0_18 = arith.constant 0 : index
    %c0_19 = arith.constant 0 : index
    %38 = vector.load %arg6[%c0_18, %c0_19] : memref<128x128xbf16, #tpu.memory_space<vmem>>, vector<128x128xbf16>
    %cst_20 = arith.constant dense<0.000000e+00> : vector<8x128xf32>
    %39 = tpu.matmul %20, %38, %cst_20 {dimension_numbers = #tpu.dot_dimension_numbers<[1], [0], [0], [1], [0, 0, 1, 1], [], []>} : vector<8x128xbf16>, vector<128x128xbf16>, vector<8x128xf32> -> vector<8x128xf32>
    %40 = arith.truncf %37 : vector<8x128xf32> to vector<8x128xbf16>
    %c0_21 = arith.constant 0 : index
    %c0_22 = arith.constant 0 : index
    %41 = vector.load %arg7[%c0_21, %c0_22] : memref<128x128xbf16, #tpu.memory_space<vmem>>, vector<128x128xbf16>
    %cst_23 = arith.constant dense<0.000000e+00> : vector<8x128xf32>
    %42 = tpu.matmul %40, %41, %cst_23 {dimension_numbers = #tpu.dot_dimension_numbers<[1], [0], [0], [1], [0, 0, 1, 1], [], []>} : vector<8x128xbf16>, vector<128x128xbf16>, vector<8x128xf32> -> vector<8x128xf32>
    %43 = arith.addf %39, %42 : vector<8x128xf32>
    %c0_24 = arith.constant 0 : index
    %c0_25 = arith.constant 0 : index
    %44 = vector.load %arg8[%c0_24, %c0_25] : memref<1x128xf32, #tpu.memory_space<vmem>>, vector<1x128xf32>
    %45 = vector.broadcast %44 : vector<1x128xf32> to vector<8x128xf32>
    %46 = arith.addf %43, %45 : vector<8x128xf32>
    %c0_26 = arith.constant 0 : index
    %c0_27 = arith.constant 0 : index
    %c0_28 = arith.constant 0 : index
    %47 = vector.load %arg9[%c0_26, %c0_27, %c0_28] : memref<1x8x128xf32, #tpu.memory_space<vmem>>, vector<1x8x128xf32>
    %48 = vector.shape_cast %47 : vector<1x8x128xf32> to vector<8x128xf32>
    %49 = vector.shape_cast %46 : vector<8x128xf32> to vector<1x8x128xf32>
    tpu.vector_store %arg9[%c0_26, %c0_27, %c0_28], %49 {strides = array<i32>} : memref<1x8x128xf32, #tpu.memory_space<vmem>>, vector<1x8x128xf32>,
    return
  }
  func.func @transform_0(%arg0: i32) -> (i32, i32, i32) {
    %c0_i32 = arith.constant 0 : i32
    %c0_i32_0 = arith.constant 0 : i32
    %c0_i32_1 = arith.constant 0 : i32
    return %arg0, %c0_i32, %c0_i32_0 : i32, i32, i32
  }
  func.func @transform_1(%arg0: i32) -> (i32, i32) {
    %c0_i32 = arith.constant 0 : i32
    %c0_i32_0 = arith.constant 0 : i32
    %c0_i32_1 = arith.constant 0 : i32
    return %c0_i32, %c0_i32_0 : i32, i32
  }
  func.func @transform_2(%arg0: i32) -> (i32, i32) {
    %c0_i32 = arith.constant 0 : i32
    %c0_i32_0 = arith.constant 0 : i32
    %c0_i32_1 = arith.constant 0 : i32
    return %c0_i32, %c0_i32_0 : i32, i32
  }
  func.func @transform_3(%arg0: i32) -> (i32, i32, i32) {
    %c0_i32 = arith.constant 0 : i32
    %c0_i32_0 = arith.constant 0 : i32
    %c0_i32_1 = arith.constant 0 : i32
    return %arg0, %c0_i32, %c0_i32_0 : i32, i32, i32
  }
  func.func @transform_4(%arg0: i32) -> (i32, i32) {
    %c0_i32 = arith.constant 0 : i32
    %c0_i32_0 = arith.constant 0 : i32
    %c0_i32_1 = arith.constant 0 : i32
    return %c0_i32, %c0_i32_0 : i32, i32
  }
  func.func @transform_5(%arg0: i32) -> (i32, i32) {
    %c0_i32 = arith.constant 0 : i32
    %c0_i32_0 = arith.constant 0 : i32
    %c0_i32_1 = arith.constant 0 : i32
    return %c0_i32, %c0_i32_0 : i32, i32
  }
  func.func @transform_6(%arg0: i32) -> (i32, i32) {
    %c0_i32 = arith.constant 0 : i32
    %c0_i32_0 = arith.constant 0 : i32
    %c0_i32_1 = arith.constant 0 : i32
    return %c0_i32, %c0_i32_0 : i32, i32
  }
  func.func @transform_7(%arg0: i32) -> (i32, i32) {
    %c0_i32 = arith.constant 0 : i32
    %c0_i32_0 = arith.constant 0 : i32
    %c0_i32_1 = arith.constant 0 : i32
    return %c0_i32, %c0_i32_0 : i32, i32
  }
  func.func @transform_8(%arg0: i32) -> (i32, i32, i32) {
    %c0_i32 = arith.constant 0 : i32
    %c0_i32_0 = arith.constant 0 : i32
    %c0_i32_1 = arith.constant 0 : i32
    return %arg0, %c0_i32, %c0_i32_0 : i32, i32, i32
  }
}

</mosaic_0001>

<bundles_post_ra>
// kernel: tpu_custom_call.1
= control target key start
LH: loop header
LB: loop body
LE: loop exit
PB: predicated region body
PF: predicated region fallthrough
CT: control target
= control target key end

     0   :  { %13 = vsyncpa [#allocation3], 0  ;;  %s1878_s0 = inlined_call_operand.hbm [shape: f32[2,16,32], index: 0, kind: input, shape index: {}]   ;;  %s1879_s1 = inlined_call_operand.vmem [shape: bf16[32,128], index: 1, kind: input, shape index: {}]   ;;  %s1880_s2 = inlined_call_operand.vmem [shape: f32[1,128], index: 2, kind: input, shape index: {}]   ;;  %s1881_s3 = inlined_call_operand.vmem [shape: s32[2,8,1], index: 3, kind: input, shape index: {}]   ;;  %s1882_s4 = inlined_call_operand.hbm [shape: bf16[128,128], index: 4, kind: input, shape index: {}]   ;;  %s1883_s5 = inlined_call_operand.hbm [shape: bf16[128,128], index: 5, kind: input, shape index: {}]   ;;  %s1884_s6 = inlined_call_operand.hbm [shape: bf16[128,128], index: 6, kind: input, shape index: {}]   ;;  %s1885_s7 = inlined_call_operand.vmem [shape: f32[1,128], index: 7, kind: input, shape index: {}]   ;;  %s1886_s8 = inlined_call_operand.hbm [shape: f32[2,8,128], index: 8, kind: output, shape index: {}]  }
   0x1   :  { %15 = vsyncpa [#allocation3 + $0x1], 0 }
   0x2   :  { %16 = vsyncpa [#allocation6], 0 }
   0x3   :  { %17 = vsyncpa [#allocation9], 0 }
   0x4   :  { %18 = vsyncpa [#allocation4], 0 }
   0x5   :  { %20 = vsyncpa [#allocation4 + $0x1], 0  ;;  %s1551_s27 = smov 0   ;;  %s1553_s28 = smov 0  }
   0x6   :  { %s1555_s29 = smov 0   ;;  %s1557_s30 = smov 0  }
   0x7 LB: > { %1892 = sst [smem:[#allocation15_spill]] %s1479_s27  ;;  %s1572_s9 = sadd.s32 4294967295, %s1491_s30   ;;  %s1491_s30 = sphi %s1557_s30, %s1915_s30   ;;  %s1487_s29 = sphi %s1555_s29, %s1914_s29   ;;  %s1483_s28 = sphi %s1553_s28, %s1913_s28   ;;  %s1479_s27 = sphi %s1551_s27, %s1912_s27  }
   0x8   : > { %s1015_s10 = sadd.s32 4294967294, %s1491_s30   ;;  %p46_p0 = scmp.ne.s32.totalorder %s1483_s28, %s1479_s27 }
   0x9   : > { %p1887_p1 = scmp.eq.s32.totalorder %s1572_s9, 0  ;;  %p228_p3 = scmp.eq.s32.totalorder %s1015_s10, 1 }
   0xa   : > { %p1016_p5 = scmp.ge.s32.totalorder %s1491_s30, 1  ;;  %p235_p7 = scmp.lt.s32.totalorder %s1491_s30, 3 }
   0xb   : > { %p1581_p4 = por %p1887_p1, %p46_p0  ;;  %p1586_p6 = por %p228_p3, %p46_p0 }
   0xc   : > { %p1591_p8 = pnand %p1016_p5, %p235_p7  ;;  %s1493_s14 = smov [#allocation5]  }
   0xd   : > { %s1893_s11 = scalar_select %p1581_p4, 1, 0 }
   0xe   : > { %s1894_s12 = scalar_select %p1586_p6, 1, 0 }
   0xf   : > { %s1896_s13 = scalar_select %p1591_p8, 1, 0 }
  0x10   : > { %1895 = sst [smem:[#allocation16_spill]] %s1894_s12  ;;  %s253_s15 = sshll.u32 %s1493_s14, 4  ;;  %s1595_s15 = int_to_ptr.vmem [resolvable:$true] %s253_s15 }
  0x11   : > { %p1199_p9 = pneg %p1591_p8  ;;  %s1494_s17 = smov [#allocation7]  }
  0x12   : > { %s266_s18 = sshll.u32 %s1494_s17, 4  ;;  %s1495_s19 = smov [#allocation8]   ;;  %s1606_s18 = int_to_ptr.vmem [resolvable:$true] %s266_s18 }
  0x13   : > { %p1602_p11 = pnand %p1199_p9, %p1887_p1  ;;  %s1608_s20 = sshll.u32 %s1495_s19, 4  ;;  %s280_s20 = int_to_ptr.vmem [resolvable:$true] %s1608_s20 }
  0x14   : > { %s1303_s23 = scalar_lea.hbm %s1882_s4, 1024 }
  0x15   : > { %p1304_p12 = scmp.ne.s32.totalorder %s1882_s4, %s1303_s23  ;;  %p1618_p13 = pneg %p1602_p11 }
  0x16   : > { %p1310_p5 = scmp.lt.u32.totalorder %s1303_s23, %s1882_s4 }
  0x17   : > { %p1306_p0 = pnand %p1618_p13, %p1304_p12 }
  0x19   : > { %p1307_p3 = pneg %p1306_p0 }
  0x1b   : > { %p1312_p7 = pnand %p1310_p5, %p1307_p3 }
  0x1d   : > { %1315 = shalt.err (!%p1312_p7)
}
  0x1e   : > { %s1316_s17 = scalar_lea.vmem %s1595_s15, 1024  ;;  %p1324_p2 = scmp.lt.s32.totalorder %s1595_s15, %s1595_s15 }
  0x1f   : > { %p1317_p9 = scmp.ne.s32.totalorder %s1595_s15, %s1316_s17  ;;  %p1325_p6 = scmp.lt.s32.totalorder %s1316_s17, %s1316_s17 }
  0x21   : > { %p1319_p10 = pnand %p1317_p9, %p1618_p13  ;;  %p1326_p12 = por %p1325_p6, %p1324_p2 }
  0x23   : > { %p1320_p1 = pneg %p1319_p10 }
  0x25   : > { %p1327_p0 = pnand %p1326_p12, %p1320_p1 }
  0x27   : > { %1330 = shalt.err (!%p1327_p0)
}
  0x28   : > { %s1496_s19 = smov 64   ;;  %s1497_s21 = smov 4  }
  0x29   : > { %1202 = dma.hbm_to_vmem [thread:$0]  (!%p1602_p11), %s1882_s4, 1024, %s1595_s15, [#allocation6], %s1496_s19, %s1496_s19, %s1497_s21  }
  0x2a   : > { %s1331_s10 = scalar_lea.hbm %s1883_s5, 1024 }
  0x2b   : > { %p1332_p1 = scmp.ne.s32.totalorder %s1883_s5, %s1331_s10  ;;  %p1338_p10 = scmp.lt.u32.totalorder %s1331_s10, %s1883_s5 }
  0x2d   : > { %p1334_p2 = pnand %p1332_p1, %p1618_p13 }
  0x2f   : > { %p1335_p6 = pneg %p1334_p2 }
  0x31   : > { %p1340_p3 = pnand %p1338_p10, %p1335_p6 }
  0x33   : > { %1343 = shalt.err (!%p1340_p3)
}
  0x34   : > { %s1344_s15 = scalar_lea.vmem %s1606_s18, 1024  ;;  %p1352_p12 = scmp.lt.s32.totalorder %s1606_s18, %s1606_s18 }
  0x35   : > { %p1345_p5 = scmp.ne.s32.totalorder %s1606_s18, %s1344_s15  ;;  %p1353_p0 = scmp.lt.s32.totalorder %s1344_s15, %s1344_s15 }
  0x37   : > { %p1347_p7 = pnand %p1345_p5, %p1618_p13  ;;  %p1354_p1 = por %p1353_p0, %p1352_p12 }
  0x39   : > { %p1348_p9 = pneg %p1347_p7 }
  0x3b   : > { %p1355_p2 = pnand %p1354_p1, %p1348_p9 }
  0x3d   : > { %1358 = shalt.err (!%p1355_p2)
}
  0x3e   : > { %1205 = dma.hbm_to_vmem [thread:$0]  (!%p1602_p11), %s1883_s5, 1024, %s1606_s18, [#allocation6], %s1496_s19, %s1496_s19, %s1497_s21  }
  0x3f   : > { %s1359_s24 = scalar_lea.hbm %s1884_s6, 1024 }
  0x40   : > { %p1360_p6 = scmp.ne.s32.totalorder %s1884_s6, %s1359_s24  ;;  %p1366_p5 = scmp.lt.u32.totalorder %s1359_s24, %s1884_s6 }
  0x42   : > { %p1362_p10 = pnand %p1360_p6, %p1618_p13 }
  0x44   : > { %p1363_p3 = pneg %p1362_p10 }
  0x46   : > { %p1368_p7 = pnand %p1366_p5, %p1363_p3 }
  0x48   : > { %1371 = shalt.err (!%p1368_p7)
}
  0x49   : > { %s1372_s15 = scalar_lea.vmem %s280_s20, 1024  ;;  %p1380_p1 = scmp.lt.s32.totalorder %s280_s20, %s280_s20 }
  0x4a   : > { %p1373_p9 = scmp.ne.s32.totalorder %s280_s20, %s1372_s15  ;;  %p1381_p2 = scmp.lt.s32.totalorder %s1372_s15, %s1372_s15 }
  0x4c   : > { %p1375_p12 = pnand %p1373_p9, %p1618_p13  ;;  %p1382_p4 = por %p1381_p2, %p1380_p1 }
  0x4e   : > { %p1376_p0 = pneg %p1375_p12 }
  0x50   : > { %p1383_p8 = pnand %p1382_p4, %p1376_p0 }
  0x52   : > { %1386 = shalt.err (!%p1383_p8)
}
  0x53   : > { %1208 = dma.hbm_to_vmem [thread:$0]  (!%p1602_p11), %s1884_s6, 1024, %s280_s20, [#allocation9], %s1496_s19, %s1496_s19, %s1497_s21  }
  0x54   : > { %s1691_s26 = sadd.s32 1, %s1491_s30   ;;  %s33_s12 = sadd.s32 1, %s1487_s29 }
  0x55   : > { %s30_s16 = ssub.s32 %s1491_s30, %s1691_s26  ;;  %p40_p8 = scmp.ne.s32.totalorder %s1487_s29, %s1483_s28 }
  0x56   : > { %p31_p4 = scmp.eq.s32.totalorder %s30_s16, 0  ;;  %p41_p13 = scmp.eq.s32.totalorder %s1491_s30, 0 }
  0x57   : > { %p1220_p6 = scmp.lt.s32.totalorder %s1491_s30, 2  ;;  %p1899_p3 = scmp.eq.s32.totalorder %s1572_s9, 1 }
  0x58   : > { %s1701_s22 = scalar_select %p31_p4, %s1487_s29, %s33_s12  }
  0x59   : > { %p42_p10 = por %p41_p13, %p40_p8  ;;  %p1705_p5 = por %p1899_p3, %p40_p8 }
  0x5a   : > { %s296_s24 = sand.u32 1, %s1487_s29   ;;  %s1068_s25 = sshll.u32 %s1491_s30, 8 }
  0x5b   : > { %s1021_s20 = sshll.u32 %s296_s24, 4  ;;  %s1714_s10 = scalar_lea.hbm %s1878_s0, %s1068_s25 }
  0x5c   : > { %s300_s14 = scalar_lea.vmem [#allocation2], %s1021_s20  ;;  %p1716_p11 = pnand %p1220_p6, %p42_p10 }
  0x5d   : > { %s307_s17 = sshll.u32 %s300_s14, 4  ;;  %s1722_s18 = scalar_lea.sflag [#allocation3], %s296_s24  ;;  %s1720_s17 = int_to_ptr.vmem [resolvable:$true] %s307_s17 }
  0x5e   : > { %s1387_s27 = scalar_lea.hbm %s1714_s10, 256  ;;  %p1389_p9 = pneg %p1716_p11 }
  0x5f   : > { %p1388_p7 = scmp.ne.s32.totalorder %s1714_s10, %s1387_s27  ;;  %s1392_s25 = scalar_lea.hbm %s1878_s0, 512 }
  0x60   : > { %p1393_p1 = scmp.lt.u32.totalorder %s1714_s10, %s1878_s0  ;;  %p1394_p2 = scmp.lt.u32.totalorder %s1392_s25, %s1387_s27 }
  0x61   : > { %p1390_p12 = pnand %p1389_p9, %p1388_p7  ;;  %p1396_p8 = scmp.lt.u32.totalorder %s1387_s27, %s1714_s10 }
  0x62   : > { %p1395_p4 = por %p1394_p2, %p1393_p1 }
  0x63   : > { %p1391_p0 = pneg %p1390_p12 }
  0x64   : > { %p1397_p13 = por %p1396_p8, %p1395_p4 }
  0x66   : > { %p1398_p6 = pnand %p1397_p13, %p1391_p0 }
  0x68   : > { %1401 = shalt.err (!%p1398_p6)
}
  0x69   : > { %s1402_s24 = scalar_lea.vmem %s1720_s17, 256  ;;  %s1498_s21 = smov [#allocation2]  }
  0x6a   : > { %p1403_p10 = scmp.ne.s32.totalorder %s1720_s17, %s1402_s24  ;;  %s1407_s14 = sshll.u32 %s1498_s21, 4  ;;  %s1408_s14 = int_to_ptr.vmem [resolvable:$false] %s1407_s14 }
  0x6b   : > { %s1409_s16 = scalar_lea.vmem %s1408_s14, 512  ;;  %p1410_p12 = scmp.lt.s32.totalorder %s1720_s17, %s1408_s14 }
  0x6c   : > { %p1405_p3 = pnand %p1403_p10, %p1389_p9  ;;  %p1411_p1 = scmp.lt.s32.totalorder %s1409_s16, %s1402_s24 }
  0x6e   : > { %p1406_p7 = pneg %p1405_p3  ;;  %p1412_p2 = por %p1411_p1, %p1410_p12 }
  0x70   : > { %p1413_p4 = pnand %p1412_p2, %p1406_p7 }
  0x72   : > { %1416 = shalt.err (!%p1413_p4)
}
  0x73   : > { %s1499_s27 = smov 128   ;;  %s1500_s12 = smov 8  }
  0x74   : > { %1212 = dma.hbm_to_vmem [thread:$0]  (!%p1716_p11), %s1714_s10, 256, %s1720_s17, %s1722_s18, %s1499_s27, %s1499_s27, %s1500_s12  }
  0x75   : > { %p1902_p9 = scmp.ne.s32.totalorder %s1896_s13, 0 }
  0x76   : > { %s1753_s25 = sand.u32 (!%p1902_p9), 1, %s1483_s28   ;;  %p1903_p0 = scmp.ne.s32.totalorder (!%p1902_p9), %s1893_s11, 0 }
  0x77   : > { %326 = sbr.rel (%p1902_p9) target bundleno = 1458 (0x5b2), region = 52  ;;  %s1025_s20 = sshll.u32 (!%p1902_p9), %s1753_s25, 4 }
  0x78   : > { %s329_s19 = scalar_lea.sflag (!%p1902_p9), [#allocation3], %s1753_s25  ;;  %s332_s24 = scalar_lea.vmem (!%p1902_p9), [#allocation2], %s1025_s20 }
  0x7e   : > { %1462 = dma.done.wait (%p1903_p0), %s329_s19, 256  }
  0x7f   : > { %1464 = vsyncadd (%p1903_p0), %s329_s19, 4294967040  ;;  %p1904_p8 = scmp.eq.s32.totalorder %s1572_s9, 0 }
  0x81   : > { %1466 = dma.done.wait (%p1904_p8), [#allocation6], 2048   ;;  %p1905_p11 = pmov %p1904_p8 }
  0x82   : > { %p1906_p13 = pmov %p1904_p8 }
  0x83   : > { %1468 = vsyncadd (%p1905_p11), [#allocation6], 4294965248 }
  0x84   : > { %1470 = dma.done.wait (%p1906_p13), [#allocation9], 1024   ;;  %p1907_p6 = pmov %p1904_p8 }
  0x85   : > { %p381_p10 = scmp.lt.s32.totalorder %s1572_s9, 1  ;;  %v1501_v0 = vmov 0   ;;  %v1502_v1 = vmov 0.0   ;;  %vm1503_vm0 = vmmov 0   ;;  %v1269_v3 = vld [vmem:[%s1879_s1] sm:$0xff]   ;;  %v1271_v5 = vld [vmem:[%s1879_s1 + $0x8] sm:$0xff]   ;;  %v461_v16 = vlaneseq }
  0x86   : > { %1472 = vsyncadd (%p1907_p6), [#allocation9], 4294966272  ;;  %1268 = vset.pattern.permute.xlu0 %v1501_v0  ;;  %1103 = vmatprep.subr.bf16.mxu0 %v1502_v1  ;;  %v1270_v4 = vld [vmem:[#allocation5] sm:$0xff]   ;;  %v1272_v6 = vld [vmem:[#allocation5 + $0x8] sm:$0xff]   ;;  %vm412_vm1 = vcmask 261120   ;;  %vm616_vm4 = vcmask 130048  }
  0x87   : > { %s382_s11 = scalar_select %p381_p10, %s1572_s9, 1  ;;  %1111 = vmatprep.subr.bf16.mxu1 %v1502_v1  ;;  %1107 = vmatprep.mubr.msk.bf16.mxu0 %vm1503_vm0, %v1502_v1  ;;  %v386_v7 = vld [vmem:[%s332_s24] sm:$0xff]  ;;  %v387_v8 = vld [vmem:[%s332_s24 + $0x8] sm:$0xff]  ;;  %v462_v17 = vand.u32 127, %v461_v16  ;;  %v1504_v20 = vmov 1.0|1.0  }
  0x88   : > { %1127 = vmatprep.mubr.msk.bf16.mxu1 %vm1503_vm0, %v1502_v1  ;;  %1104 = vmatpush3.bf16.msra.mxu0 %v1269_v3  ;;  %v388_v9 = vpack.c.bf16 %v387_v8, %v386_v7  ;;  %v1273_v10 = vld [vmem:[#allocation5 + $0x10] sm:$0xff]   ;;  %v1274_v11 = vld [vmem:[#allocation5 + $0x18] sm:$0xff]   ;;  %v1275_v12 = vld [vmem:[#allocation5 + $0x20] sm:$0xff]   ;;  %s1029_s20 = sshll.u32 %s1753_s25, 3  ;;  %s891_s21 = scalar_lea.sflag [#allocation4], %s1753_s25 }
  0x89   : > { %s1030_s13 = sshll.u32 %s382_s11, 3  ;;  %1112 = vmatpush3.bf16.msra.mxu1 %v1270_v4  ;;  %1105 = vmatprep.subr.bf16.mxu0 %v1502_v1  ;;  %v1276_v13 = vld [vmem:[#allocation5 + $0x28] sm:$0xff]   ;;  %v1277_v14 = vld [vmem:[#allocation5 + $0x30] sm:$0xff]   ;;  %v1278_v15 = vld [vmem:[#allocation5 + $0x38] sm:$0xff]   ;;  %s1065_s11 = sshll.u32 %s1572_s9, 7 }
  0x8a   : > { %s384_s15 = scalar_lea.vmem %s1881_s3, %s1030_s13  ;;  %1113 = vmatprep.subr.bf16.mxu1 %v1502_v1  ;;  %v1279_v19 = vld [vmem:[#allocation7] sm:$0xff]   ;;  %v1280_v21 = vld [vmem:[#allocation7 + $0x8] sm:$0xff]   ;;  %v1281_v22 = vld [vmem:[#allocation7 + $0x10] sm:$0xff]   ;;  %s380_s13 = scalar_lea.vmem [#allocation10], %s1029_s20 }
  0x8b   : > { %v460_v2 = vld [vmem:[%s384_s15] sm:$0xff]  ;;  %v1282_v23 = vld [vmem:[#allocation7 + $0x18] sm:$0xff]   ;;  %v1284_v25 = vld [vmem:[#allocation7 + $0x28] sm:$0xff]   ;;  %s904_s10 = sshll.u32 %s380_s13, 4  ;;  %s1834_s18 = scalar_lea.hbm %s1886_s8, %s1065_s11  ;;  %s1836_s10 = int_to_ptr.vmem [resolvable:$true] %s904_s10 }
  0x8c   : > { %464 = vperm.xlu0 %1268, %v460_v2   ;;  %1106 = vmatpush3.bf16.msra.mxu0 %v1271_v5  ;;  %v1283_v24 = vld [vmem:[#allocation7 + $0x20] sm:$0xff]   ;;  %v1285_v26 = vld [vmem:[#allocation7 + $0x30] sm:$0xff]   ;;  %v1286_v27 = vld [vmem:[#allocation7 + $0x38] sm:$0xff]   ;;  %s1417_s9 = scalar_lea.vmem %s1836_s10, 128  ;;  %s1505_s14 = smov [#allocation10]  }
  0x8d   : > { %1114 = vmatpush3.bf16.msra.mxu1 %v1272_v6  ;;  %1131 = vmatprep.subr.bf16.mxu0 %v1502_v1  ;;  %v1031_v28 = vld [vmem:[%s1880_s2] ss:$0 sm:$0xff]  ;;  %v1288_v63 = vld [vmem:[#allocation8 + $0x8] sm:$0xff]   ;;  %v1289_v0 = vld [vmem:[#allocation8 + $0x10] sm:$0xff]   ;;  %p1418_p3 = scmp.ne.s32.totalorder %s1836_s10, %s1417_s9  ;;  %s1421_s16 = sshll.u32 %s1505_s14, 4  ;;  %s1422_s16 = int_to_ptr.vmem [resolvable:$false] %s1421_s16 }
  0x8e   : > { %1115 = vmatprep.subr.bf16.mxu1 %v1502_v1  ;;  %v1287_v61 = vld [vmem:[#allocation8] sm:$0xff]   ;;  %v1290_v2 = vld [vmem:[#allocation8 + $0x18] sm:$0xff]   ;;  %v1292_v4 = vld [vmem:[#allocation8 + $0x28] sm:$0xff]   ;;  %s1423_s27 = scalar_lea.vmem %s1422_s16, 256  ;;  %p1424_p1 = scmp.lt.s32.totalorder %s1836_s10, %s1422_s16 }
  0x8f   : > { %1108 = vmatmul.mubr.msk.bf16.vlgmr.msra.gmra.mrb[0].mxu0 %vm412_vm1, %v388_v9  ;;  %v1291_v3 = vld [vmem:[#allocation8 + $0x20] sm:$0xff]   ;;  %v1293_v5 = vld [vmem:[#allocation8 + $0x30] sm:$0xff]   ;;  %v1294_v6 = vld [vmem:[#allocation8 + $0x38] sm:$0xff]   ;;  %p1419_p7 = pnand %p1418_p3, %p1705_p5  ;;  %p1425_p2 = scmp.lt.s32.totalorder %s1423_s27, %s1417_s9 }
  0x90   : > { %1133 = vmatprep.mubr.msk.bf16.mxu0 %vm1503_vm0, %v1502_v1 }
  0x91   : > { %1116 = vmatpush3.bf16.msra.mxu1 %v1273_v10  ;;  %p1420_p12 = pneg %p1419_p7  ;;  %p1426_p4 = por %p1425_p2, %p1424_p1 }
  0x92   : > { %1117 = vmatprep.subr.bf16.mxu1 %v1502_v1 }
  0x93   : > { %p1427_p9 = pnand %p1426_p4, %p1420_p12 }
  0x95   : > { %1118 = vmatpush3.bf16.msra.mxu1 %v1274_v11 }
  0x96   : > { %1119 = vmatprep.subr.bf16.mxu1 %v1502_v1 }
  0x99   : > { %1120 = vmatpush3.bf16.msra.mxu1 %v1275_v12 }
  0x9a   : > { %1121 = vmatprep.subr.bf16.mxu1 %v1502_v1 }
  0x9d   : > { %1122 = vmatpush3.bf16.msra.mxu1 %v1276_v13  ;;  %v1063_v13 = vld [vmem:[%s1885_s7] ss:$0 sm:$0xff] }
  0x9e   : > { %1123 = vmatprep.subr.bf16.mxu1 %v1502_v1 }
  0xa1   : > { %1124 = vmatpush3.bf16.msra.mxu1 %v1277_v14 }
  0xa2   : > { %1125 = vmatprep.subr.bf16.mxu1 %v1502_v1 }
  0xa5   : > { %1126 = vmatpush3.bf16.msra.mxu1 %v1278_v15 }
  0xa6   : > { %1163 = vmatprep.subr.bf16.mxu1 %v1502_v1 }
 0x10b   : > { %v465_v18 = vpop.permute.xlu0 %464 }
 0x10c   : > { %vm466_vm2 = vcmp.eq.s32.totalorder %v465_v18, %v462_v17 }
 0x10d   : > { %vm1044_vm3 = vmpackc.low %vm466_vm2, %vm466_vm2 }
 0x10e   : > { %1128 = vmatmul.mubr.msk.bf16.vlgmr.msra.gmra.mrb[0].mxu1 %vm1044_vm3, %v1504_v20 }
 0x10f   : > { %1164 = vmatpush3.bf16.msra.mxu1 %v1279_v19  ;;  %1179 = vmatprep.mubr.msk.bf16.mxu1 %vm1503_vm0, %v1502_v1 }
 0x110   : > { %1165 = vmatprep.subr.bf16.mxu1 %v1502_v1 }
 0x113   : > { %1166 = vmatpush3.bf16.msra.mxu1 %v1280_v21 }
 0x114   : > { %1167 = vmatprep.subr.bf16.mxu1 %v1502_v1 }
 0x117   : > { %1168 = vmatpush3.bf16.msra.mxu1 %v1281_v22 }
 0x118   : > { %1169 = vmatprep.subr.bf16.mxu1 %v1502_v1 }
 0x11b   : > { %1170 = vmatpush3.bf16.msra.mxu1 %v1282_v23 }
 0x11c   : > { %1171 = vmatprep.subr.bf16.mxu1 %v1502_v1 }
 0x11f   : > { %1172 = vmatpush3.bf16.msra.mxu1 %v1283_v24 }
 0x120   : > { %1173 = vmatprep.subr.bf16.mxu1 %v1502_v1 }
 0x123   : > { %1174 = vmatpush3.bf16.msra.mxu1 %v1284_v25 }
 0x124   : > { %1175 = vmatprep.subr.bf16.mxu1 %v1502_v1 }
 0x127   : > { %1176 = vmatpush3.bf16.msra.mxu1 %v1285_v26 }
 0x128   : > { %1177 = vmatprep.subr.bf16.mxu1 %v1502_v1 }
 0x12b   : > { %1178 = vmatpush3.bf16.msra.mxu1 %v1286_v27 }
 0x162   : > { %v450_v29 = vpop.f32.mrb[0].mxu0 }
 0x163   : > { %v451_v30 = vadd.f32 %v1031_v28, %v450_v29  ;;  %v1109_v31 = vpop.f32.mrb[1].mxu0 }
 0x164   : > { %v453_v32 = vpop.f32.mrb[2].mxu0 }
 0x165   : > { %1295 = vtanh.f32 %v451_v30  ;;  %v454_v33 = vadd.f32 %v1031_v28, %v453_v32  ;;  %v1110_v34 = vpop.f32.mrb[3].mxu0 }
 0x167   : > { %1297 = vtanh.f32 %v454_v33 }
 0x16f   : > { %v1296_v35 = vpop.eup %1295 }
 0x171   : > { %v1298_v36 = vpop.eup %1297 }
 0x172   : > { %v459_v37 = vpack.c.bf16 %v1298_v36, %v1296_v35 }
 0x174   : > { %1132 = vmatpush3.bf16.xpose.msra.mxu0 %v459_v37 }
 0x175   : > { %1137 = vmatprep.subr.bf16.mxu0 %v1502_v1 }
 0x1e1   : > { %v568_v38 = vpop.f32.mrb[0].mxu1 }
 0x1e2   : > { %v574_v39 = vpack.c.bf16 %v568_v38, %v568_v38  ;;  %v1129_v40 = vpop.f32.mrb[1].mxu1 }
 0x1e3   : > { %v571_v41 = vpop.f32.mrb[2].mxu1 }
 0x1e4   : > { %v1130_v42 = vpop.f32.mrb[3].mxu1  ;;  %1134 = vmatmul.mubr.bf16.vlgmr.msra.gmra.mrb[4].mxu0 %v574_v39  ;;  %1180 = vmatmul.mubr.bf16.vlgmr.msra.gmra.mrb[4].mxu1 %v574_v39 }
 0x1e5   : > { %1138 = vmatpush3.bf16.msra.mxu0 %v459_v37  ;;  %1139 = vmatprep.mubr.msk.bf16.mxu0 %vm1503_vm0, %v1502_v1 }
 0x1e6   : > { %1143 = vmatprep.subr.bf16.mxu0 %v1502_v1 }
 0x2b7   : > { %v609_v43 = vpop.f32.mrb[4].mxu0  ;;  %v875_v44 = vpop.f32.mrb[4].mxu1 }
 0x2b8   : > { %v615_v45 = vmul.f32 0.17677669, %v609_v43  ;;  %v1135_v46 = vpop.f32.mrb[5].mxu0  ;;  %v1181_v47 = vpop.f32.mrb[5].mxu1 }
 0x2b9   : > { %v612_v48 = vpop.f32.mrb[6].mxu0  ;;  %v878_v49 = vpop.f32.mrb[6].mxu1 }
 0x2ba   : > { %v1136_v50 = vpop.f32.mrb[7].mxu0  ;;  %v1182_v51 = vpop.f32.mrb[7].mxu1  ;;  %v617_v52 = vsel %vm616_vm4, %v615_v45, -inf }
 0x2bb   : > { %618 = vmax.xlane.f32.xlu0 %v617_v52 }
 0x348   : > { %v619_v53 = vpop.xlane.xlu0 %618 }
 0x349   : > { %v620_v54 = vsub.f32 %v615_v45, %v619_v53 }
 0x34b   : > { %v621_v55 = vmul.f32 1.442695, %v620_v54 }
 0x34d   : > { %1299 = vpow2.f32 %v621_v55 }
 0x357   : > { %v1300_v56 = vpop.eup %1299 }
 0x358   : > { %v623_v57 = vsel %vm616_vm4, %v1300_v56, 0.0 }
 0x359   : > { %624 = vadd.xlane.f32.xlu1 %v623_v57 }
 0x3e6   : > { %v625_v58 = vpop.xlane.xlu1 %624 }
 0x3e7   : > { %1301 = vrcp.f32 %v625_v58 }
 0x3f1   : > { %v1302_v59 = vpop.eup %1301 }
 0x3f2   : > { %v627_v60 = vmul.f32 %v1302_v59, %v1300_v56 }
 0x3f4   : > { %v628_v62 = vpack.c.bf16 %v627_v60, %v627_v60 }
 0x3f6   : > { %1140 = vmatmul.mubr.msk.bf16.vlgmr.msra.gmra.mrb[8].mxu0 %vm616_vm4, %v628_v62 }
 0x3f7   : > { %1144 = vmatpush3.bf16.msra.mxu0 %v1287_v61  ;;  %1159 = vmatprep.mubr.msk.bf16.mxu0 %vm1503_vm0, %v1502_v1 }
 0x3f8   : > { %1145 = vmatprep.subr.bf16.mxu0 %v1502_v1 }
 0x3fb   : > { %1146 = vmatpush3.bf16.msra.mxu0 %v1288_v63 }
 0x3fc   : > { %1147 = vmatprep.subr.bf16.mxu0 %v1502_v1 }
 0x3ff   : > { %1148 = vmatpush3.bf16.msra.mxu0 %v1289_v0 }
 0x400   : > { %1149 = vmatprep.subr.bf16.mxu0 %v1502_v1 }
 0x403   : > { %1150 = vmatpush3.bf16.msra.mxu0 %v1290_v2 }
 0x404   : > { %1151 = vmatprep.subr.bf16.mxu0 %v1502_v1 }
 0x407   : > { %1152 = vmatpush3.bf16.msra.mxu0 %v1291_v3 }
 0x408   : > { %1153 = vmatprep.subr.bf16.mxu0 %v1502_v1 }
 0x40b   : > { %1154 = vmatpush3.bf16.msra.mxu0 %v1292_v4 }
 0x40c   : > { %1155 = vmatprep.subr.bf16.mxu0 %v1502_v1 }
 0x40f   : > { %1156 = vmatpush3.bf16.msra.mxu0 %v1293_v5 }
 0x410   : > { %1157 = vmatprep.subr.bf16.mxu0 %v1502_v1 }
 0x413   : > { %1158 = vmatpush3.bf16.msra.mxu0 %v1294_v6 }
 0x4c9   : > { %v666_v7 = vpop.f32.mrb[8].mxu0 }
 0x4ca   : > { %v688_v8 = vpack.c.bf16 %v666_v7, %v666_v7  ;;  %v1141_v9 = vpop.f32.mrb[9].mxu0 }
 0x4cb   : > { %v669_v10 = vpop.f32.mrb[10].mxu0 }
 0x4cc   : > { %v1142_v11 = vpop.f32.mrb[11].mxu0  ;;  %1160 = vmatmul.mubr.bf16.vlgmr.msra.gmra.mrb[12].mxu0 %v688_v8 }
 0x59f   : > { %v787_v12 = vpop.f32.mrb[12].mxu0 }
 0x5a0   : > { %v876_v1 = vadd.f32 %v875_v44, %v787_v12  ;;  %v1161_v14 = vpop.f32.mrb[13].mxu0 }
 0x5a1   : > { %v790_v15 = vpop.f32.mrb[14].mxu0 }
 0x5a2   : > { %v888_v16 = vadd.f32 %v1063_v13, %v876_v1  ;;  %v1162_v17 = vpop.f32.mrb[15].mxu0 }
 0x5a4   : > { %889 = vst [vmem:[%s380_s13] sm:$0xff] %v888_v16 }
 0x5a5   : > { %1430 = shalt.err (!%p1427_p9)
}
 0x5a6   : > { %s1431_s25 = scalar_lea.hbm %s1834_s18, 128  ;;  %s1435_s19 = scalar_lea.hbm %s1886_s8, 256 }
 0x5a7   : > { %p1432_p0 = scmp.ne.s32.totalorder %s1834_s18, %s1431_s25  ;;  %p1436_p13 = scmp.lt.u32.totalorder %s1834_s18, %s1886_s8 }
 0x5a8   : > { %p1437_p6 = scmp.lt.u32.totalorder %s1435_s19, %s1431_s25  ;;  %p1439_p3 = scmp.lt.u32.totalorder %s1431_s25, %s1834_s18 }
 0x5a9   : > { %p1433_p8 = pnand %p1432_p0, %p1705_p5 }
 0x5aa   : > { %p1438_p10 = por %p1437_p6, %p1436_p13 }
 0x5ab   : > { %p1434_p11 = pneg %p1433_p8 }
 0x5ac   : > { %p1440_p7 = por %p1439_p3, %p1438_p10 }
 0x5ae   : > { %p1441_p12 = pnand %p1440_p7, %p1434_p11 }
 0x5b0   : > { %1444 = shalt.err (!%p1441_p12)
}
 0x5b1   : > { %1197 = dma.vmem_to_hbm [thread:$0]  (%p1705_p5), %s1836_s10, 128, %s1834_s18, %s891_s21  }
 0x5b2 PF: > { %s1908_s13 = sld [smem:[#allocation15_spill]]  ;;  %s1909_s17 = sld [smem:[#allocation16_spill]] }
 0x5b3   : > { %p1911_p2 = scmp.ge.s32.totalorder %s1491_s30, 2 }
 0x5b8   : > { %s916_s15 = sand.u32 1, %s1908_s13   ;;  %p1910_p1 = scmp.ne.s32.totalorder %s1909_s17, 0 }
 0x5b9   : > { %s917_s9 = scalar_lea.sflag [#allocation4], %s916_s15 }
 0x5ba   : > { %p1214_p4 = pnand %p1911_p2, %p1910_p1 }
 0x5bc   : > { %1474 = dma.done.wait (!%p1214_p4), %s917_s9, 128  }
 0x5bd   : > { %1476 = vsyncadd (!%p1214_p4), %s917_s9, 4294967168  ;;  %p23_p9 = scmp.ge.s32.totalorder %s1691_s26, 4   ;;  %s1912_s27 = smov %s1483_s28 }
 0x5be   : > { %s1913_s28 = smov %s1487_s29  ;;  %s1914_s29 = smov %s1701_s22 }
 0x5bf   : > { %s1915_s30 = smov %s1691_s26  ;;  %25 = sbr.rel (!%p23_p9) target bundleno = 7 (0x7), region = 112 }
 0x5c6   :  { %922 = vsyncpa [#allocation3], 1 }
 0x5c7   :  { %924 = vsyncpa [#allocation3 + $0x1], 1 }
 0x5c8   :  { %925 = vsyncpa [#allocation6], 1 }
 0x5c9   :  { %926 = vsyncpa [#allocation9], 1 }
 0x5ca   :  { %927 = vsyncpa [#allocation4], 1 }
 0x5cb   :  { %929 = vsyncpa [#allocation4 + $0x1], 1 }

</bundles_post_ra>
